<compile_context>
chip_gen: v6e
topology: v6e:2x2x1
jax: 0.10.0
libtpu: 0.0.40
codegen_flags: <defaults>
</compile_context>

<pallas_src>
import functools

import jax
import jax.numpy as jnp
import numpy as np
from jax.experimental import pallas as pl
from jax.experimental.pallas import tpu as pltpu

_LANE = 128
_MAX_TILE_LANES = 64 * _LANE      # caps the unrolled per-tile chunk loop at 64


def _round_up(x, m):
    return ((x + m - 1) // m) * m


def _vmem_limit_bytes():
    """Generation-aware scoped-VMEM limit (explicit; never rely on defaults)."""
    cap = 64 * 1024 * 1024
    try:
        info = pltpu.get_tpu_info()
        cap = int(getattr(info, "vmem_capacity_bytes", cap))
    except Exception:
        pass
    # ~75% of physical VMEM, capped at 64 MiB:
    #   v7x (64 MiB / TensorCore) -> 48 MiB ; v5e/v6e (128 MiB) -> 64 MiB.
    return min(3 * cap // 4, 64 * 1024 * 1024)


_VMEM_LIMIT = _vmem_limit_bytes()
# Pass-2 footprint ~= 4x tile (double-buffered input + double-buffered output).
_TILE_BUDGET = _VMEM_LIMIT // 8


def _plan_spatial_tiling(hw, c, elem_bytes):
    """Return (HWT, n_hw, HWP) avoiding padding whenever possible."""
    max_lanes = (_TILE_BUDGET // max(c * elem_bytes, 1)) // _LANE * _LANE
    max_lanes = max(_LANE, min(max_lanes, _MAX_TILE_LANES))
    if hw <= max_lanes:
        return hw, 1, hw                        # one full-width tile, no pad
    if hw % _LANE == 0:
        # Largest multiple-of-128 divisor of hw that fits the budget -> no pad.
        k = hw // _LANE
        d = max_lanes // _LANE
        while d > 1 and k % d != 0:
            d -= 1
        hwt = d * _LANE
        return hwt, hw // hwt, hw
    # Ragged hw spanning multiple tiles: minimal zero-pad (< HWT extra lanes).
    # TODO(synk): mask the last tile in-kernel to drop the pad/slice copies.
    n_hw = -(-hw // max_lanes)
    hwt = _round_up(-(-hw // n_hw), _LANE)
    return hwt, n_hw, n_hw * hwt


# ---------------------------------------------------------------------------
# Fused single-pass kernel (whole slab resident): stats + affine + normalize.
# ---------------------------------------------------------------------------
def _make_fused_kernel(eps):
    def kernel(x_ref, gain_ref, bias_ref, o_ref, mean_ref, var_ref):
        n, c, hw = x_ref.shape
        m = n * hw
        x = x_ref[...].astype(jnp.float32)                    # (N, C, HW)
        s = jnp.sum(x, axis=0, keepdims=True)                 # (1, C, HW) VPU
        mean = jnp.sum(s, axis=2, keepdims=True) / m          # (1, C, 1)  XLU once
        xc = x - mean
        sq = jnp.sum(xc * xc, axis=0, keepdims=True)
        var = jnp.sum(sq, axis=2, keepdims=True) / m          # (1, C, 1)
        inv_std = jax.lax.rsqrt(var + eps)
        scale = gain_ref[...].astype(jnp.float32) * inv_std   # (N, C, 1)
        shift = bias_ref[...].astype(jnp.float32)             # (N, C, 1)
        o_ref[...] = (xc * scale + shift).astype(o_ref.dtype)
        mean_ref[...] = mean[0]                                # (C, 1)
        var_ref[...] = var[0]                                  # (C, 1)
    return kernel


# ---------------------------------------------------------------------------
# Pass 1: per-(n, c) lane-dense partial sum & sum-of-squares.
# x block: (C, HWT)   outputs: (C, L) each, resident across the spatial axis.
# ---------------------------------------------------------------------------
def _stats_kernel(x_ref, psum_ref, psq_ref):
    @pl.when(pl.program_id(2) == 0)
    def _():
        psum_ref[...] = jnp.zeros_like(psum_ref)
        psq_ref[...] = jnp.zeros_like(psq_ref)

    c, hwt = x_ref.shape
    if hwt % _LANE == 0:
        # Lane-dense (C,128) partials: 128-aligned static slices are free, the
        # accumulation is pure VPU adds (no cross-lane XLU reduce per step, no
        # masked 1-lane accumulator store).  Cross-lane reduce happens once in
        # the tiny JAX combine.
        acc_s = jnp.zeros((c, _LANE), jnp.float32)
        acc_q = jnp.zeros((c, _LANE), jnp.float32)
        for k in range(hwt // _LANE):
            chunk = x_ref[:, k * _LANE:(k + 1) * _LANE].astype(jnp.float32)
            acc_s = acc_s + chunk
            acc_q = acc_q + chunk * chunk
        psum_ref[...] += acc_s
        psq_ref[...] += acc_q
    else:
        # Ragged single full-width tile (HWT == HW, HW % 128 != 0).
        x = x_ref[...].astype(jnp.float32)
        psum_ref[...] += jnp.sum(x, axis=-1, keepdims=True)
        psq_ref[...] += jnp.sum(x * x, axis=-1, keepdims=True)


# ---------------------------------------------------------------------------
# Pass 2: y[n, c, s] = x[n, c, s] * scale[n, c] + shift[n, c]
# ---------------------------------------------------------------------------
def _norm_kernel(x_ref, scale_ref, shift_ref, o_ref):
    # TODO(synk): on v6e/v7x with bf16 inputs this FMA could run in bf16 to
    # halve VALU work; kept in f32 for exact parity with the PyTorch path.
    x = x_ref[...].astype(jnp.float32)                        # (C, HWT)
    o_ref[...] = (x * scale_ref[...] + shift_ref[...]).astype(o_ref.dtype)


@functools.partial(jax.jit, static_argnames=("eps", "momentum", "force_two_pass"))
def ccbn_forward(x_nchw, y_cond, w_gain, w_bias, stored_mean, stored_var,
                 *, eps=1e-5, momentum=0.1, force_two_pass=False):
    """Training-mode ccbn forward (norm_style='bn').

    Returns (out_nchw, new_stored_mean, new_stored_var).
    """
    N, C, H, W = x_nchw.shape
    HW = H * W
    M = N * HW
    x_flat = x_nchw.reshape(N, C, HW)              # free reshape, no transpose
    elem = x_flat.dtype.itemsize

    # Class-conditional per-sample gain/bias (tiny (N,Z)x(Z,C) matmuls; JAX).
    # TODO(synk): `which_linear` may be a spectral-norm Linear or Embedding in
    # the original; modeled here as a plain no-bias Linear.
    gain = 1.0 + jnp.dot(y_cond, w_gain.T).astype(jnp.float32)     # (N, C)
    bias = jnp.dot(y_cond, w_bias.T).astype(jnp.float32)           # (N, C)

    slab = N * C * HW
    fused_footprint = 4 * slab * elem + 3 * slab * 4   # 2x in + 2x out + f32 temps

    if (not force_two_pass) and fused_footprint <= _VMEM_LIMIT:
        # ---- fused single-pass path: 2x-tensor-size HBM traffic ------------
        out_flat, mean_c1, var_c1 = pl.pallas_call(
            _make_fused_kernel(eps),
            out_shape=(jax.ShapeDtypeStruct((N, C, HW), x_flat.dtype),
                       jax.ShapeDtypeStruct((C, 1), jnp.float32),
                       jax.ShapeDtypeStruct((C, 1), jnp.float32)),
            compiler_params=pltpu.CompilerParams(
                vmem_limit_bytes=_VMEM_LIMIT),
        )(x_flat, gain.reshape(N, C, 1), bias.reshape(N, C, 1))
        mean = mean_c1[:, 0]
        var = var_c1[:, 0]
        out = out_flat.reshape(N, C, H, W)
    else:
        # ---- two-pass path --------------------------------------------------
        HWT, n_hw, HWP = _plan_spatial_tiling(HW, C, elem)
        if HWP != HW:
            # Only for ragged multi-tile HW; zeros do not corrupt the sums.
            x_flat = jnp.pad(x_flat, ((0, 0), (0, 0), (0, HWP - HW)))
        L = _LANE if HWT % _LANE == 0 else 1

        # Size-2 spatial split so both v7x TensorCores are busy even when N is
        # small/odd (no-op on single-TC v5e/v6e).
        nsplit = 2 if (n_hw >= 2 and n_hw % 2 == 0) else 1
        n_hw_s = n_hw // nsplit

        psum, psq = pl.pallas_call(
            _stats_kernel,
            out_shape=(jax.ShapeDtypeStruct((nsplit, N, C, L), jnp.float32),
                       jax.ShapeDtypeStruct((nsplit, N, C, L), jnp.float32)),
            grid_spec=pltpu.PrefetchScalarGridSpec(
                num_scalar_prefetch=0,
                grid=(nsplit, N, n_hw_s),
                in_specs=[pl.BlockSpec(
                    (None, C, HWT),
                    lambda s, n, h: (n, 0, s * n_hw_s + h))],
                out_specs=[
                    pl.BlockSpec((None, None, C, L), lambda s, n, h: (s, n, 0, 0)),
                    pl.BlockSpec((None, None, C, L), lambda s, n, h: (s, n, 0, 0)),
                ],
            ),
            compiler_params=pltpu.CompilerParams(
                dimension_semantics=("parallel", "parallel", "arbitrary"),
                vmem_limit_bytes=_VMEM_LIMIT),
        )(x_flat)

        sum_c = jnp.sum(psum, axis=(0, 1, 3))           # (C,)
        sq_c = jnp.sum(psq, axis=(0, 1, 3))             # (C,)
        mean = sum_c / M
        # TODO(synk): single-pass E[x^2]-E[x]^2 still loses precision when
        # |mean| >> std; the lane partials above already reduce cancellation.
        var = jnp.maximum(sq_c / M - mean * mean, 0.0)  # biased variance (C,)
        inv_std = jax.lax.rsqrt(var + eps)

        scale = gain * inv_std[None, :]                 # (N, C)
        shift = bias - mean[None, :] * scale            # (N, C)

        y_flat = pl.pallas_call(
            _norm_kernel,
            out_shape=jax.ShapeDtypeStruct((N, C, HWP), x_flat.dtype),
            grid_spec=pltpu.PrefetchScalarGridSpec(
                num_scalar_prefetch=0,
                grid=(N, n_hw),
                in_specs=[
                    pl.BlockSpec((None, C, HWT), lambda n, h: (n, 0, h)),
                    pl.BlockSpec((None, C, 1), lambda n, h: (n, 0, 0)),
                    pl.BlockSpec((None, C, 1), lambda n, h: (n, 0, 0)),
                ],
                out_specs=pl.BlockSpec((None, C, HWT), lambda n, h: (n, 0, h)),
            ),
            compiler_params=pltpu.CompilerParams(
                dimension_semantics=("parallel", "parallel"),
                vmem_limit_bytes=_VMEM_LIMIT),
        )(x_flat, scale.reshape(N, C, 1), shift.reshape(N, C, 1))

        out = (y_flat if HWP == HW else y_flat[:, :, :HW]).reshape(N, C, H, W)

    # Running-buffer update of F.batch_norm(training=True): unbiased variance.
    unbiased_var = var * (M / max(M - 1, 1))
    new_mean = (1.0 - momentum) * stored_mean + momentum * mean
    new_var = (1.0 - momentum) * stored_var + momentum * unbiased_var
    return out, new_mean, new_var


def _reference(x, y_cond, w_gain, w_bias, eps):
    xf = x.astype(jnp.float32)
    mean = jnp.mean(xf, axis=(0, 2, 3), keepdims=True)
    var = jnp.mean((xf - mean) ** 2, axis=(0, 2, 3), keepdims=True)
    out = (xf - mean) / jnp.sqrt(var + eps)
    gain = (1.0 + y_cond @ w_gain.T)[:, :, None, None]
    bias = (y_cond @ w_bias.T)[:, :, None, None]
    return out * gain + bias


if __name__ == "__main__":
    key = jax.random.PRNGKey(0)
    N, C, H, W, ZDIM = 2, 4, 16, 16, 32
    kx, ky, kg, kb = jax.random.split(key, 4)
    x = jax.random.normal(kx, (N, C, H, W), dtype=jnp.float32)
    y_cond = jax.random.normal(ky, (N, ZDIM), dtype=jnp.float32)
    # which_linear -> no-bias Linear projections, deterministic init.
    w_gain = 0.1 * jax.random.normal(kg, (C, ZDIM), dtype=jnp.float32)
    w_bias = 0.1 * jax.random.normal(kb, (C, ZDIM), dtype=jnp.float32)
    stored_mean = jnp.zeros((C,), jnp.float32)
    stored_var = jnp.ones((C,), jnp.float32)

    # References.
    ref = _reference(x, y_cond, w_gain, w_bias, 1e-5)
    xf = x.astype(jnp.float32)
    bmean = jnp.mean(xf, axis=(0, 2, 3))
    bvar = jnp.var(xf, axis=(0, 2, 3))
    Mtot = N * H * W
    ref_mean = 0.9 * stored_mean + 0.1 * bmean
    ref_var = 0.9 * stored_var + 0.1 * (bvar * Mtot / (Mtot - 1))

    # Exercise both the fused single-pass path and the two-pass tiled path.
    for force in (False, True):
        out, new_mean, new_var = ccbn_forward(
            x, y_cond, w_gain, w_bias, stored_mean, stored_var,
            eps=1e-5, momentum=0.1, force_two_pass=force)
        jax.block_until_ready((out, new_mean, new_var))
        np.testing.assert_allclose(np.asarray(out), np.asarray(ref),
                                   rtol=1e-5, atol=1e-5)
        np.testing.assert_allclose(np.asarray(new_mean), np.asarray(ref_mean),
                                   rtol=1e-5, atol=1e-5)
        np.testing.assert_allclose(np.asarray(new_var), np.asarray(ref_var),
                                   rtol=1e-5, atol=1e-5)

    print("KERNEL_OK")
</pallas_src>

<mosaic_0001>
module attributes {stable_mosaic.version = 11 : i64} {
  func.func @kernel(%arg0: memref<2x4x256xf32, #tpu.memory_space<vmem>>, %arg1: memref<2x4x1xf32, #tpu.memory_space<vmem>>, %arg2: memref<2x4x1xf32, #tpu.memory_space<vmem>>, %arg3: memref<2x4x256xf32, #tpu.memory_space<vmem>>, %arg4: memref<4x1xf32, #tpu.memory_space<vmem>>, %arg5: memref<4x1xf32, #tpu.memory_space<vmem>>) attributes {dimension_semantics = [], scalar_prefetch = 0 : i64, scratch_operands = 0 : i64, tpu.core_type = #tpu.core_type<tc>} {
    %c0 = arith.constant 0 : index
    %c0_0 = arith.constant 0 : index
    %c0_1 = arith.constant 0 : index
    %0 = vector.load %arg0[%c0, %c0_0, %c0_1] : memref<2x4x256xf32, #tpu.memory_space<vmem>>, vector<2x4x256xf32>
    %cst = arith.constant dense<0.000000e+00> : vector<4x256xf32>
    %1 = vector.multi_reduction <add>, %0, %cst [0] : vector<2x4x256xf32> to vector<4x256xf32>
    %2 = vector.shape_cast %1 : vector<4x256xf32> to vector<1x4x256xf32>
    %cst_2 = arith.constant dense<0.000000e+00> : vector<1x4xf32>
    %3 = vector.multi_reduction <add>, %2, %cst_2 [2] : vector<1x4x256xf32> to vector<1x4xf32>
    %4 = vector.shape_cast %3 : vector<1x4xf32> to vector<1x4x1xf32>
    %cst_3 = arith.constant 5.120000e+02 : f32
    %5 = vector.broadcast %cst_3 : f32 to vector<1x4x1xf32>
    %6 = arith.divf %4, %5 : vector<1x4x1xf32>
    %7 = vector.broadcast %6 : vector<1x4x1xf32> to vector<2x4x256xf32>
    %8 = arith.subf %0, %7 : vector<2x4x256xf32>
    %9 = arith.mulf %8, %8 : vector<2x4x256xf32>
    %cst_4 = arith.constant dense<0.000000e+00> : vector<4x256xf32>
    %10 = vector.multi_reduction <add>, %9, %cst_4 [0] : vector<2x4x256xf32> to vector<4x256xf32>
    %11 = vector.shape_cast %10 : vector<4x256xf32> to vector<1x4x256xf32>
    %cst_5 = arith.constant dense<0.000000e+00> : vector<1x4xf32>
    %12 = vector.multi_reduction <add>, %11, %cst_5 [2] : vector<1x4x256xf32> to vector<1x4xf32>
    %13 = vector.shape_cast %12 : vector<1x4xf32> to vector<1x4x1xf32>
    %cst_6 = arith.constant 5.120000e+02 : f32
    %14 = vector.broadcast %cst_6 : f32 to vector<1x4x1xf32>
    %15 = arith.divf %13, %14 : vector<1x4x1xf32>
    %cst_7 = arith.constant 9.99999974E-6 : f32
    %16 = vector.broadcast %cst_7 : f32 to vector<1x4x1xf32>
    %17 = arith.addf %15, %16 : vector<1x4x1xf32>
    %18 = math.rsqrt %17 : vector<1x4x1xf32>
    %c0_8 = arith.constant 0 : index
    %c0_9 = arith.constant 0 : index
    %c0_10 = arith.constant 0 : index
    %19 = vector.load %arg1[%c0_8, %c0_9, %c0_10] : memref<2x4x1xf32, #tpu.memory_space<vmem>>, vector<2x4x1xf32>
    %20 = vector.broadcast %18 : vector<1x4x1xf32> to vector<2x4x1xf32>
    %21 = arith.mulf %19, %20 : vector<2x4x1xf32>
    %c0_11 = arith.constant 0 : index
    %c0_12 = arith.constant 0 : index
    %c0_13 = arith.constant 0 : index
    %22 = vector.load %arg2[%c0_11, %c0_12, %c0_13] : memref<2x4x1xf32, #tpu.memory_space<vmem>>, vector<2x4x1xf32>
    %23 = vector.broadcast %21 : vector<2x4x1xf32> to vector<2x4x256xf32>
    %24 = arith.mulf %8, %23 : vector<2x4x256xf32>
    %25 = vector.broadcast %22 : vector<2x4x1xf32> to vector<2x4x256xf32>
    %26 = arith.addf %24, %25 : vector<2x4x256xf32>
    %c0_14 = arith.constant 0 : index
    %c0_15 = arith.constant 0 : index
    %c0_16 = arith.constant 0 : index
    %27 = vector.load %arg3[%c0_14, %c0_15, %c0_16] : memref<2x4x256xf32, #tpu.memory_space<vmem>>, vector<2x4x256xf32>
    tpu.vector_store %arg3[%c0_14, %c0_15, %c0_16], %26 {strides = array<i32>} : memref<2x4x256xf32, #tpu.memory_space<vmem>>, vector<2x4x256xf32>,
    %28 = vector.shape_cast %6 : vector<1x4x1xf32> to vector<4x1xf32>
    %c0_17 = arith.constant 0 : index
    %c0_18 = arith.constant 0 : index
    %29 = vector.load %arg4[%c0_17, %c0_18] : memref<4x1xf32, #tpu.memory_space<vmem>>, vector<4x1xf32>
    tpu.vector_store %arg4[%c0_17, %c0_18], %28 {strides = array<i32>} : memref<4x1xf32, #tpu.memory_space<vmem>>, vector<4x1xf32>,
    %30 = vector.shape_cast %15 : vector<1x4x1xf32> to vector<4x1xf32>
    %c0_19 = arith.constant 0 : index
    %c0_20 = arith.constant 0 : index
    %31 = vector.load %arg5[%c0_19, %c0_20] : memref<4x1xf32, #tpu.memory_space<vmem>>, vector<4x1xf32>
    tpu.vector_store %arg5[%c0_19, %c0_20], %30 {strides = array<i32>} : memref<4x1xf32, #tpu.memory_space<vmem>>, vector<4x1xf32>,
    return
  }
}

</mosaic_0001>

<bundles_post_ra>
// kernel: ccbn_forward.1
= control target key start
LH: loop header
LB: loop body
LE: loop exit
PB: predicated region body
PF: predicated region fallthrough
CT: control target
= control target key end

     0   :  { %vm25_vm0 = vcmask 1043456   ;;  %v155_v13 = vmov 839922192   ;;  %v43_v15 = vlaneseq  ;;  %vm132_vm1 = vcmask 3072   ;;  %s231_s0 = inlined_call_operand.vmem [shape: f32[2,4,256], index: 0, kind: input, shape index: {}]   ;;  %s232_s4 = inlined_call_operand.vmem [shape: f32[4,1], index: 4, kind: output, shape index: {1}]   ;;  %s233_s2 = inlined_call_operand.vmem [shape: f32[2,4,1], index: 2, kind: input, shape index: {}]   ;;  %s234_s5 = inlined_call_operand.vmem [shape: f32[4,1], index: 5, kind: output, shape index: {2}]   ;;  %s235_s1 = inlined_call_operand.vmem [shape: f32[2,4,1], index: 1, kind: input, shape index: {}]   ;;  %s236_s3 = inlined_call_operand.vmem [shape: f32[2,4,256], index: 3, kind: output, shape index: {0}]  }
   0x1   :  { %v17_v0 = vld [vmem:[%s231_s0] sm:$0xff]  ;;  %v18_v1 = vld [vmem:[%s231_s0 + $0x8] sm:$0xff]  ;;  %v41_v14 = vunpack.c.l.s4 %v155_v13  ;;  %v156_v37 = vmov 0  }
   0x2   :  { %v21_v2 = vcombine.high %v17_v0, %v17_v0  ;;  %v22_v3 = vcombine.high %v18_v1, %v18_v1  ;;  %v26_v4 = vsel %vm25_vm0, %v17_v0, 0.0  ;;  %v27_v5 = vsel %vm25_vm0, %v18_v1, 0.0  ;;  %149 = vset.pattern.permute.xlu1 %v156_v37  ;;  %150 = vset.pattern.permute.xlu0 %v156_v37  ;;  %v76_v38 = vld [vmem:[%s233_s2] sm:$0xf]  ;;  %v73_v45 = vld [vmem:[%s235_s1 + $0x4] sm:$0xf] }
   0x3   :  { %v28_v6 = vadd.f32 %v27_v5, %v26_v4  ;;  %v42_v16 = vunpack.c.0.s8 %v41_v14  ;;  %v44_v17 = vshrl.u32 %v43_v15, 7  ;;  %v72_v42 = vld [vmem:[%s235_s1] sm:$0xf]  ;;  %v77_v47 = vld [vmem:[%s233_s2 + $0x4] sm:$0xf] }
   0x4   :  { %v29_v7 = vsel %vm25_vm0, %v21_v2, 0.0  ;;  %v30_v8 = vsel %vm25_vm0, %v22_v3, 0.0 }
   0x5   :  { %v31_v9 = vadd.f32 %v30_v8, %v29_v7  ;;  %v32_v10 = vsel %vm25_vm0, %v28_v6, 0.0  ;;  %v45_v18 = vsub.s32 %v42_v16, %v44_v17 }
   0x7   :  { %v33_v11 = vsel %vm25_vm0, %v31_v9, 0.0 }
   0x8   :  { %v34_v12 = vadd.f32 %v33_v11, %v32_v10 }
   0xa   :  { %35 = vadd.xlane.f32.xlu0 %v34_v12 }
  0x93   :  { %v36_v19 = vpop.xlane.xlu0 %35 }
  0x94   :  { %v38_v20 = vmul.f32 0.001953125, %v36_v19 }
  0x96   :  { %v46_v21 = vrot.slane %v38_v20, %v45_v18  ;;  %133 = vst.msk [vmem:[%s232_s4] sm:$0xf] %vm132_vm1, %v38_v20 }
  0x98   :  { %v48_v22 = vsub.f32 %v17_v0, %v46_v21  ;;  %v49_v23 = vsub.f32 %v18_v1, %v46_v21 }
  0x9a   :  { %v50_v24 = vmul.f32 %v48_v22, %v48_v22  ;;  %v51_v25 = vmul.f32 %v49_v23, %v49_v23 }
  0x9c   :  { %v54_v26 = vcombine.high %v50_v24, %v50_v24  ;;  %v55_v27 = vcombine.high %v51_v25, %v51_v25  ;;  %v58_v28 = vsel %vm25_vm0, %v50_v24, 0.0  ;;  %v59_v29 = vsel %vm25_vm0, %v51_v25, 0.0 }
  0x9d   :  { %v60_v30 = vadd.f32 %v59_v29, %v58_v28 }
  0x9e   :  { %v61_v31 = vsel %vm25_vm0, %v54_v26, 0.0  ;;  %v62_v32 = vsel %vm25_vm0, %v55_v27, 0.0 }
  0x9f   :  { %v63_v33 = vadd.f32 %v62_v32, %v61_v31  ;;  %v64_v34 = vsel %vm25_vm0, %v60_v30, 0.0 }
  0xa1   :  { %v65_v35 = vsel %vm25_vm0, %v63_v33, 0.0 }
  0xa2   :  { %v66_v36 = vadd.f32 %v65_v35, %v64_v34 }
  0xa4   :  { %67 = vadd.xlane.f32.xlu0 %v66_v36 }
  0xba   :  { %106 = vperm.xlu0 %150, %v76_v38  }
 0x12d   :  { %v68_v39 = vpop.xlane.xlu0 %67 }
 0x12e   :  { %v69_v40 = vmul.f32 0.001953125, %v68_v39 }
 0x130   :  { %v70_v41 = vadd.f32 1e-05, %v69_v40  ;;  %134 = vst.msk [vmem:[%s234_s5] sm:$0xf] %vm132_vm1, %v69_v40 }
 0x132   :  { %153 = vrsqrt.f32 %v70_v41 }
 0x135   :  { %v107_v48 = vpop.permute.xlu0 %106 }
 0x136   :  { %v118_v51 = vrot.slane %v107_v48, %v45_v18 }
 0x13f   :  { %v154_v43 = vpop.eup %153 }
 0x140   :  { %v74_v44 = vmul.f32 %v154_v43, %v72_v42  ;;  %v75_v46 = vmul.f32 %v154_v43, %v73_v45 }
 0x142   :  { %80 = vperm.xlu1 %149, %v74_v44  }
 0x146   :  { %84 = vperm.xlu1 %149, %v75_v46  }
 0x14a   :  { %110 = vperm.xlu1 %149, %v77_v47  }
 0x1bd   :  { %v81_v49 = vpop.permute.xlu1 %80 }
 0x1be   :  { %v92_v50 = vrot.slane %v81_v49, %v45_v18 }
 0x1c0   :  { %v102_v52 = vmul.f32 %v92_v50, %v48_v22 }
 0x1c1   :  { %v85_v53 = vpop.permute.xlu1 %84 }
 0x1c2   :  { %v128_v54 = vadd.f32 %v118_v51, %v102_v52  ;;  %v99_v55 = vrot.slane %v85_v53, %v45_v18 }
 0x1c4   :  { %130 = vst [vmem:[%s236_s3] sm:$0xff] %v128_v54  ;;  %v103_v57 = vmul.f32 %v99_v55, %v49_v23 }
 0x1c5   :  { %v111_v56 = vpop.permute.xlu1 %110 }
 0x1c6   :  { %v125_v58 = vrot.slane %v111_v56, %v45_v18 }
 0x1c8   :  { %v129_v59 = vadd.f32 %v125_v58, %v103_v57 }
 0x1ca   :  { %131 = vst [vmem:[%s236_s3 + $0x8] sm:$0xff] %v129_v59 }

</bundles_post_ra>
